<compile_context>
chip_gen: v7x
topology: tpu7x:2x2x1
jax: 0.10.0
libtpu: 0.0.40
codegen_flags: <defaults>
</compile_context>

<pallas_src>
import functools

import jax
import jax.numpy as jnp
from jax.experimental import pallas as pl
from jax.experimental.pallas import tpu as pltpu

EPS = 1e-5
NEG_SLOPE = 0.01
# MXU operand dtype: bf16 is the native MXU path on v5e/v6e/v7x.  Accumulation
# is f32 (preferred_element_type) and every non-matmul op stays f32.
MXU_DTYPE = jnp.bfloat16


def residual_block_kernel(x_ref, w1_ref, w2_ref,
                          g1_ref, b1_ref, g2_ref, b2_ref,
                          o_ref, xp_ref, *, n, c):
    """Whole block in one invocation; everything VMEM-resident & lane-dense.

    x_ref : (H*N, W*C)           f32  input; row = y*N + n, lane = x*C + ch
    w*_ref: (3, (W+2)*C, W*C)    bf16 banded conv weights, one slab per ky tap
    g*/b* : (1, W*C)             f32  BN gamma/beta pre-broadcast to lanes
    o_ref : (H*N, W*C)           f32  output (single lane-dense store)
    xp_ref: ((H+2)*N, (W+2)*C)   bf16 padded-activation scratch (both convs)
    """
    hn, wc = x_ref.shape
    h = hn // n
    inv_cnt = 1.0 / (hn * (wc // c))              # 1 / (N*H*W)

    # Zero the padded scratch once: the halo (first/last N rows + trailing
    # 2*C halo lanes) stays zero for both convs; the interior is overwritten.
    xp_ref[...] = jnp.zeros(xp_ref.shape, xp_ref.dtype)

    def conv3x3(src, w_ref):
        """src: (H*N, W*C) f32 value -> (H*N, W*C) f32 conv output."""
        # interior rows [N, (H+1)*N), interior lanes [0, W*C); halo stays 0
        xp_ref[n:(h + 1) * n, 0:wc] = src.astype(xp_ref.dtype)
        xp = xp_ref[...]                           # one aligned whole-ref load
        # One wide MXU matmul per ky tap over the full padded plane; the ky
        # shift is applied to the f32 outputs (sublane shifts, off the vld
        # path) so the bf16 LHS read stays aligned.  First tap inits acc.
        acc = jnp.dot(xp, w_ref[0], preferred_element_type=jnp.float32)[0:hn]
        acc = acc + jnp.dot(xp, w_ref[1],
                            preferred_element_type=jnp.float32)[n:n + hn]
        acc = acc + jnp.dot(xp, w_ref[2],
                            preferred_element_type=jnp.float32)[2 * n:2 * n + hn]
        return acc

    def bn_scale_bias(hval, g_row, b_row):
        """Fused single-pass BN stats -> per-lane (scale, bias), shape (1, W*C)."""
        # stacked [sum; sum-of-squares] row, kept in f32 (cancellation-prone)
        s12 = jnp.concatenate(
            [jnp.sum(hval, axis=0, keepdims=True),
             jnp.sum(hval * hval, axis=0, keepdims=True)], axis=0)   # (2, WC)
        # per-channel fold + broadcast across the W lane groups: log2(W)
        # roll/add steps on the XLU (W must be a power of two).
        sh = c
        while sh < wc:
            s12 = s12 + pltpu.roll(s12, shift=sh, axis=1)
            sh *= 2
        mean = s12[0:1, :] * inv_cnt
        var = s12[1:2, :] * inv_cnt - mean * mean        # biased variance
        scale = g_row * jax.lax.rsqrt(var + EPS)         # rsqrt -> EUP slot
        bias = b_row - mean * scale
        return scale, bias

    # conv1 -> BN1 -> LeakyReLU(0.01)   (x read once here, not kept live)
    h1 = conv3x3(x_ref[...], w1_ref)
    sc1, bi1 = bn_scale_bias(h1, g1_ref[...], b1_ref[...])
    h1 = h1 * sc1 + bi1
    h1 = jnp.where(h1 > 0, h1, NEG_SLOPE * h1)

    # conv2 -> BN2; residual add fused into the single lane-dense output store
    h2 = conv3x3(h1, w2_ref)
    sc2, bi2 = bn_scale_bias(h2, g2_ref[...], b2_ref[...])
    o_ref[...] = x_ref[...] + h2 * sc2 + bi2


def _banded_conv_weight(w, width):
    """(Cout, Cin, 3, 3) PyTorch conv weight -> (3, (W+2)*Cin, W*Cout) slabs.

    Row index = block*Cin + ci, where blocks 0..W-1 are the interior input
    columns and blocks W / W+1 are the left / right zero-halo columns (kept at
    the end so the kernel's interior writes stay lane-aligned).
    Column index = x_out*Cout + co.
    """
    cout, cin, kh, kw = w.shape
    wk = jnp.transpose(w, (2, 3, 1, 0))                      # (ky, kx, ci, co)
    col_of = jnp.concatenate([jnp.arange(width),
                              jnp.array([-1, width])])       # input col per block
    x_out = jnp.arange(width)
    dx = jnp.arange(kw)
    # sel[kx, block, x_out] = 1  iff  col_of[block] == x_out + kx - 1
    sel = (col_of[None, :, None] ==
           (x_out[None, None, :] + dx[:, None, None] - 1)).astype(w.dtype)
    wbig = jnp.einsum('dpx,ydio->ypixo', sel, wk)            # (ky, W+2, Cin, W, Cout)
    return wbig.reshape(kh, (width + 2) * cin, width * cout)


def residual_block(x_nchw, params):
    """x_nchw: (N, C, H, W) like PyTorch; returns (N, C, H, W)."""
    w1, g1, b1, w2, g2, b2 = params                          # w*: (Cout, Cin, 3, 3)
    N, C, H, W = x_nchw.shape
    WC, PWC = W * C, (W + 2) * C
    assert W & (W - 1) == 0, "BN channel fold uses log2(W) lane rolls"

    # NCHW -> lane-dense, (y, n)-major slab: row = y*N + n, lane = x*C + c
    x2d = jnp.transpose(x_nchw, (2, 0, 3, 1)).reshape(H * N, WC)

    w1b = _banded_conv_weight(w1, W).astype(MXU_DTYPE)       # layout plumbing
    w2b = _banded_conv_weight(w2, W).astype(MXU_DTYPE)

    g1r = jnp.tile(g1, W).reshape(1, WC)
    b1r = jnp.tile(b1, W).reshape(1, WC)
    g2r = jnp.tile(g2, W).reshape(1, WC)
    b2r = jnp.tile(b2, W).reshape(1, WC)

    # Advisory cost hint so XLA schedules neighbors around the custom call.
    m_rows = (H + 2) * N
    cost = pl.CostEstimate(
        flops=2 * 3 * 2 * m_rows * PWC * WC,                 # 2 convs x 3 taps
        transcendentals=2 * WC,                              # 2 BN rsqrt rows
        bytes_accessed=4 * (2 * H * N * WC + 4 * WC)         # x, out, gammas/betas
                        + 2 * (w1b.size + w2b.size))         # bf16 banded weights

    vmem = pl.BlockSpec(memory_space=pltpu.MemorySpace.VMEM)
    kernel = functools.partial(residual_block_kernel, n=N, c=C)
    out2d = pl.pallas_call(
        kernel,
        out_shape=jax.ShapeDtypeStruct((H * N, WC), jnp.float32),
        in_specs=[vmem] * 7,
        out_specs=vmem,
        scratch_shapes=[
            pltpu.VMEM(((H + 2) * N, PWC), MXU_DTYPE),       # padded conv taps
        ],
        cost_estimate=cost,
    )(x2d, w1b, w2b, g1r, b1r, g2r, b2r)

    return jnp.transpose(out2d.reshape(H, N, W, C), (1, 3, 0, 2))


def residual_block_ref(x, params):
    """Pure-JAX reference (NCHW) mirroring the PyTorch forward."""
    w1, g1, b1, w2, g2, b2 = params

    def conv(z, w):
        return jax.lax.conv_general_dilated(
            z, w, window_strides=(1, 1), padding=((1, 1), (1, 1)),
            dimension_numbers=('NCHW', 'OIHW', 'NCHW'))

    def bn(z, g, b):
        m = jnp.mean(z, axis=(0, 2, 3), keepdims=True)
        v = jnp.mean((z - m) ** 2, axis=(0, 2, 3), keepdims=True)
        return ((z - m) * jax.lax.rsqrt(v + EPS) * g.reshape(1, -1, 1, 1)
                + b.reshape(1, -1, 1, 1))

    h = conv(x, w1)
    h = bn(h, g1, b1)
    h = jnp.where(h > 0, h, NEG_SLOPE * h)
    h = conv(h, w2)
    h = bn(h, g2, b2)
    return x + h


if __name__ == "__main__":
    N, C, H, W = 2, 8, 16, 16        # dim_in == dim_out (residual); W*C == 128 lanes
    key = jax.random.PRNGKey(0)
    kx, kw1, kw2 = jax.random.split(key, 3)

    x = jax.random.normal(kx, (N, C, H, W), jnp.float32)

    # Deterministic init: conv weights uniform(-bound, bound) (kaiming-uniform
    # style bound), BN gamma=1 / beta=0 (PyTorch defaults).
    bound = 1.0 / (C * 9) ** 0.5
    w1 = jax.random.uniform(kw1, (C, C, 3, 3), jnp.float32, -bound, bound)
    w2 = jax.random.uniform(kw2, (C, C, 3, 3), jnp.float32, -bound, bound)
    g1 = jnp.ones((C,), jnp.float32)
    b1 = jnp.zeros((C,), jnp.float32)
    g2 = jnp.ones((C,), jnp.float32)
    b2 = jnp.zeros((C,), jnp.float32)
    params = (w1, g1, b1, w2, g2, b2)

    out = jax.block_until_ready(residual_block(x, params))
    ref = jax.block_until_ready(residual_block_ref(x, params))

    assert out.shape == (N, C, H, W) and out.dtype == jnp.float32
    # bf16 MXU operands (f32 accumulation / f32 BN math): elementwise error is
    # ~3e-3 std after the second BN's ~3x variance normalization, so the max
    # over 4096 outputs can reach ~1.3e-2 vs the all-f32 reference.
    assert jnp.allclose(out, ref, rtol=1e-2, atol=2e-2), (
        f"max abs diff {jnp.max(jnp.abs(out - ref))}")

    print("KERNEL_OK")
</pallas_src>

<mosaic_0001>
module attributes {stable_mosaic.version = 11 : i64} {
  func.func @residual_block_kernel(%arg0: memref<32x128xf32, #tpu.memory_space<vmem>>, %arg1: memref<3x144x128xbf16, #tpu.memory_space<vmem>>, %arg2: memref<3x144x128xbf16, #tpu.memory_space<vmem>>, %arg3: memref<1x128xf32, #tpu.memory_space<vmem>>, %arg4: memref<1x128xf32, #tpu.memory_space<vmem>>, %arg5: memref<1x128xf32, #tpu.memory_space<vmem>>, %arg6: memref<1x128xf32, #tpu.memory_space<vmem>>, %arg7: memref<32x128xf32, #tpu.memory_space<vmem>>, %arg8: memref<36x144xbf16, #tpu.memory_space<vmem>>) attributes {dimension_semantics = [], scalar_prefetch = 0 : i64, scratch_operands = 1 : i64, tpu.core_type = #tpu.core_type<tc>} {
    %cst = arith.constant 0.000000e+00 : bf16
    %0 = vector.broadcast %cst : bf16 to vector<36x144xbf16>
    %c0 = arith.constant 0 : index
    %c0_0 = arith.constant 0 : index
    %1 = vector.load %arg8[%c0, %c0_0] : memref<36x144xbf16, #tpu.memory_space<vmem>>, vector<36x144xbf16>
    tpu.vector_store %arg8[%c0, %c0_0], %0 {strides = array<i32>} : memref<36x144xbf16, #tpu.memory_space<vmem>>, vector<36x144xbf16>,
    %c0_1 = arith.constant 0 : index
    %c0_2 = arith.constant 0 : index
    %2 = vector.load %arg0[%c0_1, %c0_2] : memref<32x128xf32, #tpu.memory_space<vmem>>, vector<32x128xf32>
    %3 = arith.truncf %2 : vector<32x128xf32> to vector<32x128xbf16>
    %c2 = arith.constant 2 : index
    %c0_3 = arith.constant 0 : index
    %4 = vector.load %arg8[%c2, %c0_3] : memref<36x144xbf16, #tpu.memory_space<vmem>>, vector<32x128xbf16>
    tpu.vector_store %arg8[%c2, %c0_3], %3 {strides = array<i32>} : memref<36x144xbf16, #tpu.memory_space<vmem>>, vector<32x128xbf16>,
    %c0_4 = arith.constant 0 : index
    %c0_5 = arith.constant 0 : index
    %5 = vector.load %arg8[%c0_4, %c0_5] : memref<36x144xbf16, #tpu.memory_space<vmem>>, vector<36x144xbf16>
    %c0_6 = arith.constant 0 : index
    %c0_7 = arith.constant 0 : index
    %c0_8 = arith.constant 0 : index
    %6 = vector.load %arg1[%c0_6, %c0_7, %c0_8] : memref<3x144x128xbf16, #tpu.memory_space<vmem>>, vector<1x144x128xbf16>
    %7 = vector.shape_cast %6 : vector<1x144x128xbf16> to vector<144x128xbf16>
    %cst_9 = arith.constant dense<0.000000e+00> : vector<36x128xf32>
    %8 = tpu.matmul %5, %7, %cst_9 {dimension_numbers = #tpu.dot_dimension_numbers<[1], [0], [0], [1], [0, 0, 1, 1], [], []>} : vector<36x144xbf16>, vector<144x128xbf16>, vector<36x128xf32> -> vector<36x128xf32>
    %9 = vector.extract_strided_slice %8 {offsets = [0, 0], sizes = [32, 128], strides = [1, 1]} : vector<36x128xf32> to vector<32x128xf32>
    %c1 = arith.constant 1 : index
    %c0_10 = arith.constant 0 : index
    %c0_11 = arith.constant 0 : index
    %10 = vector.load %arg1[%c1, %c0_10, %c0_11] : memref<3x144x128xbf16, #tpu.memory_space<vmem>>, vector<1x144x128xbf16>
    %11 = vector.shape_cast %10 : vector<1x144x128xbf16> to vector<144x128xbf16>
    %cst_12 = arith.constant dense<0.000000e+00> : vector<36x128xf32>
    %12 = tpu.matmul %5, %11, %cst_12 {dimension_numbers = #tpu.dot_dimension_numbers<[1], [0], [0], [1], [0, 0, 1, 1], [], []>} : vector<36x144xbf16>, vector<144x128xbf16>, vector<36x128xf32> -> vector<36x128xf32>
    %13 = vector.extract_strided_slice %12 {offsets = [2, 0], sizes = [32, 128], strides = [1, 1]} : vector<36x128xf32> to vector<32x128xf32>
    %14 = arith.addf %9, %13 : vector<32x128xf32>
    %c2_13 = arith.constant 2 : index
    %c0_14 = arith.constant 0 : index
    %c0_15 = arith.constant 0 : index
    %15 = vector.load %arg1[%c2_13, %c0_14, %c0_15] : memref<3x144x128xbf16, #tpu.memory_space<vmem>>, vector<1x144x128xbf16>
    %16 = vector.shape_cast %15 : vector<1x144x128xbf16> to vector<144x128xbf16>
    %cst_16 = arith.constant dense<0.000000e+00> : vector<36x128xf32>
    %17 = tpu.matmul %5, %16, %cst_16 {dimension_numbers = #tpu.dot_dimension_numbers<[1], [0], [0], [1], [0, 0, 1, 1], [], []>} : vector<36x144xbf16>, vector<144x128xbf16>, vector<36x128xf32> -> vector<36x128xf32>
    %18 = vector.extract_strided_slice %17 {offsets = [4, 0], sizes = [32, 128], strides = [1, 1]} : vector<36x128xf32> to vector<32x128xf32>
    %19 = arith.addf %14, %18 : vector<32x128xf32>
    %c0_17 = arith.constant 0 : index
    %c0_18 = arith.constant 0 : index
    %20 = vector.load %arg3[%c0_17, %c0_18] : memref<1x128xf32, #tpu.memory_space<vmem>>, vector<1x128xf32>
    %c0_19 = arith.constant 0 : index
    %c0_20 = arith.constant 0 : index
    %21 = vector.load %arg4[%c0_19, %c0_20] : memref<1x128xf32, #tpu.memory_space<vmem>>, vector<1x128xf32>
    %cst_21 = arith.constant dense<0.000000e+00> : vector<128xf32>
    %22 = vector.multi_reduction <add>, %19, %cst_21 [0] : vector<32x128xf32> to vector<128xf32>
    %23 = vector.shape_cast %22 : vector<128xf32> to vector<1x128xf32>
    %24 = arith.mulf %19, %19 : vector<32x128xf32>
    %cst_22 = arith.constant dense<0.000000e+00> : vector<128xf32>
    %25 = vector.multi_reduction <add>, %24, %cst_22 [0] : vector<32x128xf32> to vector<128xf32>
    %26 = vector.shape_cast %25 : vector<128xf32> to vector<1x128xf32>
    %27 = tpu.concatenate %23, %26 in 0 : vector<1x128xf32>, vector<1x128xf32> -> vector<2x128xf32>
    %c8_i32 = arith.constant 8 : i32
    %28 = tpu.dynamic_rotate %27 by %c8_i32 dim 1 : vector<2x128xf32>, i32 -> vector<2x128xf32>
    %29 = arith.addf %27, %28 : vector<2x128xf32>
    %c16_i32 = arith.constant 16 : i32
    %30 = tpu.dynamic_rotate %29 by %c16_i32 dim 1 : vector<2x128xf32>, i32 -> vector<2x128xf32>
    %31 = arith.addf %29, %30 : vector<2x128xf32>
    %c32_i32 = arith.constant 32 : i32
    %32 = tpu.dynamic_rotate %31 by %c32_i32 dim 1 : vector<2x128xf32>, i32 -> vector<2x128xf32>
    %33 = arith.addf %31, %32 : vector<2x128xf32>
    %c64_i32 = arith.constant 64 : i32
    %34 = tpu.dynamic_rotate %33 by %c64_i32 dim 1 : vector<2x128xf32>, i32 -> vector<2x128xf32>
    %35 = arith.addf %33, %34 : vector<2x128xf32>
    %36 = vector.extract_strided_slice %35 {offsets = [0, 0], sizes = [1, 128], strides = [1, 1]} : vector<2x128xf32> to vector<1x128xf32>
    %cst_23 = arith.constant 0.001953125 : f32
    %37 = vector.broadcast %cst_23 : f32 to vector<1x128xf32>
    %38 = arith.mulf %36, %37 : vector<1x128xf32>
    %39 = vector.extract_strided_slice %35 {offsets = [1, 0], sizes = [1, 128], strides = [1, 1]} : vector<2x128xf32> to vector<1x128xf32>
    %cst_24 = arith.constant 0.001953125 : f32
    %40 = vector.broadcast %cst_24 : f32 to vector<1x128xf32>
    %41 = arith.mulf %39, %40 : vector<1x128xf32>
    %42 = arith.mulf %38, %38 : vector<1x128xf32>
    %43 = arith.subf %41, %42 : vector<1x128xf32>
    %cst_25 = arith.constant 9.99999974E-6 : f32
    %44 = vector.broadcast %cst_25 : f32 to vector<1x128xf32>
    %45 = arith.addf %43, %44 : vector<1x128xf32>
    %46 = math.rsqrt %45 : vector<1x128xf32>
    %47 = arith.mulf %20, %46 : vector<1x128xf32>
    %48 = arith.mulf %38, %47 : vector<1x128xf32>
    %49 = arith.subf %21, %48 : vector<1x128xf32>
    %50 = vector.broadcast %47 : vector<1x128xf32> to vector<32x128xf32>
    %51 = arith.mulf %19, %50 : vector<32x128xf32>
    %52 = vector.broadcast %49 : vector<1x128xf32> to vector<32x128xf32>
    %53 = arith.addf %51, %52 : vector<32x128xf32>
    %cst_26 = arith.constant 0.000000e+00 : f32
    %54 = vector.broadcast %cst_26 : f32 to vector<32x128xf32>
    %55 = arith.cmpf ogt, %53, %54 : vector<32x128xf32>
    %cst_27 = arith.constant 0.00999999977 : f32
    %56 = vector.broadcast %cst_27 : f32 to vector<32x128xf32>
    %57 = arith.mulf %56, %53 : vector<32x128xf32>
    %58 = arith.select %55, %53, %57 : vector<32x128xi1>, vector<32x128xf32>
    %59 = arith.truncf %58 : vector<32x128xf32> to vector<32x128xbf16>
    %c2_28 = arith.constant 2 : index
    %c0_29 = arith.constant 0 : index
    %60 = vector.load %arg8[%c2_28, %c0_29] : memref<36x144xbf16, #tpu.memory_space<vmem>>, vector<32x128xbf16>
    tpu.vector_store %arg8[%c2_28, %c0_29], %59 {strides = array<i32>} : memref<36x144xbf16, #tpu.memory_space<vmem>>, vector<32x128xbf16>,
    %c0_30 = arith.constant 0 : index
    %c0_31 = arith.constant 0 : index
    %61 = vector.load %arg8[%c0_30, %c0_31] : memref<36x144xbf16, #tpu.memory_space<vmem>>, vector<36x144xbf16>
    %c0_32 = arith.constant 0 : index
    %c0_33 = arith.constant 0 : index
    %c0_34 = arith.constant 0 : index
    %62 = vector.load %arg2[%c0_32, %c0_33, %c0_34] : memref<3x144x128xbf16, #tpu.memory_space<vmem>>, vector<1x144x128xbf16>
    %63 = vector.shape_cast %62 : vector<1x144x128xbf16> to vector<144x128xbf16>
    %cst_35 = arith.constant dense<0.000000e+00> : vector<36x128xf32>
    %64 = tpu.matmul %61, %63, %cst_35 {dimension_numbers = #tpu.dot_dimension_numbers<[1], [0], [0], [1], [0, 0, 1, 1], [], []>} : vector<36x144xbf16>, vector<144x128xbf16>, vector<36x128xf32> -> vector<36x128xf32>
    %65 = vector.extract_strided_slice %64 {offsets = [0, 0], sizes = [32, 128], strides = [1, 1]} : vector<36x128xf32> to vector<32x128xf32>
    %c1_36 = arith.constant 1 : index
    %c0_37 = arith.constant 0 : index
    %c0_38 = arith.constant 0 : index
    %66 = vector.load %arg2[%c1_36, %c0_37, %c0_38] : memref<3x144x128xbf16, #tpu.memory_space<vmem>>, vector<1x144x128xbf16>
    %67 = vector.shape_cast %66 : vector<1x144x128xbf16> to vector<144x128xbf16>
    %cst_39 = arith.constant dense<0.000000e+00> : vector<36x128xf32>
    %68 = tpu.matmul %61, %67, %cst_39 {dimension_numbers = #tpu.dot_dimension_numbers<[1], [0], [0], [1], [0, 0, 1, 1], [], []>} : vector<36x144xbf16>, vector<144x128xbf16>, vector<36x128xf32> -> vector<36x128xf32>
    %69 = vector.extract_strided_slice %68 {offsets = [2, 0], sizes = [32, 128], strides = [1, 1]} : vector<36x128xf32> to vector<32x128xf32>
    %70 = arith.addf %65, %69 : vector<32x128xf32>
    %c2_40 = arith.constant 2 : index
    %c0_41 = arith.constant 0 : index
    %c0_42 = arith.constant 0 : index
    %71 = vector.load %arg2[%c2_40, %c0_41, %c0_42] : memref<3x144x128xbf16, #tpu.memory_space<vmem>>, vector<1x144x128xbf16>
    %72 = vector.shape_cast %71 : vector<1x144x128xbf16> to vector<144x128xbf16>
    %cst_43 = arith.constant dense<0.000000e+00> : vector<36x128xf32>
    %73 = tpu.matmul %61, %72, %cst_43 {dimension_numbers = #tpu.dot_dimension_numbers<[1], [0], [0], [1], [0, 0, 1, 1], [], []>} : vector<36x144xbf16>, vector<144x128xbf16>, vector<36x128xf32> -> vector<36x128xf32>
    %74 = vector.extract_strided_slice %73 {offsets = [4, 0], sizes = [32, 128], strides = [1, 1]} : vector<36x128xf32> to vector<32x128xf32>
    %75 = arith.addf %70, %74 : vector<32x128xf32>
    %c0_44 = arith.constant 0 : index
    %c0_45 = arith.constant 0 : index
    %76 = vector.load %arg5[%c0_44, %c0_45] : memref<1x128xf32, #tpu.memory_space<vmem>>, vector<1x128xf32>
    %c0_46 = arith.constant 0 : index
    %c0_47 = arith.constant 0 : index
    %77 = vector.load %arg6[%c0_46, %c0_47] : memref<1x128xf32, #tpu.memory_space<vmem>>, vector<1x128xf32>
    %cst_48 = arith.constant dense<0.000000e+00> : vector<128xf32>
    %78 = vector.multi_reduction <add>, %75, %cst_48 [0] : vector<32x128xf32> to vector<128xf32>
    %79 = vector.shape_cast %78 : vector<128xf32> to vector<1x128xf32>
    %80 = arith.mulf %75, %75 : vector<32x128xf32>
    %cst_49 = arith.constant dense<0.000000e+00> : vector<128xf32>
    %81 = vector.multi_reduction <add>, %80, %cst_49 [0] : vector<32x128xf32> to vector<128xf32>
    %82 = vector.shape_cast %81 : vector<128xf32> to vector<1x128xf32>
    %83 = tpu.concatenate %79, %82 in 0 : vector<1x128xf32>, vector<1x128xf32> -> vector<2x128xf32>
    %c8_i32_50 = arith.constant 8 : i32
    %84 = tpu.dynamic_rotate %83 by %c8_i32_50 dim 1 : vector<2x128xf32>, i32 -> vector<2x128xf32>
    %85 = arith.addf %83, %84 : vector<2x128xf32>
    %c16_i32_51 = arith.constant 16 : i32
    %86 = tpu.dynamic_rotate %85 by %c16_i32_51 dim 1 : vector<2x128xf32>, i32 -> vector<2x128xf32>
    %87 = arith.addf %85, %86 : vector<2x128xf32>
    %c32_i32_52 = arith.constant 32 : i32
    %88 = tpu.dynamic_rotate %87 by %c32_i32_52 dim 1 : vector<2x128xf32>, i32 -> vector<2x128xf32>
    %89 = arith.addf %87, %88 : vector<2x128xf32>
    %c64_i32_53 = arith.constant 64 : i32
    %90 = tpu.dynamic_rotate %89 by %c64_i32_53 dim 1 : vector<2x128xf32>, i32 -> vector<2x128xf32>
    %91 = arith.addf %89, %90 : vector<2x128xf32>
    %92 = vector.extract_strided_slice %91 {offsets = [0, 0], sizes = [1, 128], strides = [1, 1]} : vector<2x128xf32> to vector<1x128xf32>
    %cst_54 = arith.constant 0.001953125 : f32
    %93 = vector.broadcast %cst_54 : f32 to vector<1x128xf32>
    %94 = arith.mulf %92, %93 : vector<1x128xf32>
    %95 = vector.extract_strided_slice %91 {offsets = [1, 0], sizes = [1, 128], strides = [1, 1]} : vector<2x128xf32> to vector<1x128xf32>
    %cst_55 = arith.constant 0.001953125 : f32
    %96 = vector.broadcast %cst_55 : f32 to vector<1x128xf32>
    %97 = arith.mulf %95, %96 : vector<1x128xf32>
    %98 = arith.mulf %94, %94 : vector<1x128xf32>
    %99 = arith.subf %97, %98 : vector<1x128xf32>
    %cst_56 = arith.constant 9.99999974E-6 : f32
    %100 = vector.broadcast %cst_56 : f32 to vector<1x128xf32>
    %101 = arith.addf %99, %100 : vector<1x128xf32>
    %102 = math.rsqrt %101 : vector<1x128xf32>
    %103 = arith.mulf %76, %102 : vector<1x128xf32>
    %104 = arith.mulf %94, %103 : vector<1x128xf32>
    %105 = arith.subf %77, %104 : vector<1x128xf32>
    %c0_57 = arith.constant 0 : index
    %c0_58 = arith.constant 0 : index
    %106 = vector.load %arg0[%c0_57, %c0_58] : memref<32x128xf32, #tpu.memory_space<vmem>>, vector<32x128xf32>
    %107 = vector.broadcast %103 : vector<1x128xf32> to vector<32x128xf32>
    %108 = arith.mulf %75, %107 : vector<32x128xf32>
    %109 = arith.addf %106, %108 : vector<32x128xf32>
    %110 = vector.broadcast %105 : vector<1x128xf32> to vector<32x128xf32>
    %111 = arith.addf %109, %110 : vector<32x128xf32>
    %c0_59 = arith.constant 0 : index
    %c0_60 = arith.constant 0 : index
    %112 = vector.load %arg7[%c0_59, %c0_60] : memref<32x128xf32, #tpu.memory_space<vmem>>, vector<32x128xf32>
    tpu.vector_store %arg7[%c0_59, %c0_60], %111 {strides = array<i32>} : memref<32x128xf32, #tpu.memory_space<vmem>>, vector<32x128xf32>,
    return
  }
}

</mosaic_0001>

<bundles_post_ra>
// kernel: tpu_custom_call.1
= control target key start
LH: loop header
LB: loop body
LE: loop exit
PB: predicated region body
PF: predicated region fallthrough
CT: control target
= control target key end

     0   :  { %12 = vsyncpa [#allocation4], 0  ;;  %s1880_s0 = inlined_call_operand.hbm [shape: f32[32,128], index: 0, kind: input, shape index: {}]   ;;  %s1881_s1 = inlined_call_operand.hbm [shape: bf16[3,144,128], index: 1, kind: input, shape index: {}]   ;;  %s1882_s2 = inlined_call_operand.hbm [shape: bf16[3,144,128], index: 2, kind: input, shape index: {}]   ;;  %s1883_s3 = inlined_call_operand.vmem [shape: f32[1,128], index: 3, kind: input, shape index: {}]   ;;  %s1884_s4 = inlined_call_operand.vmem [shape: f32[1,128], index: 4, kind: input, shape index: {}]   ;;  %s1885_s5 = inlined_call_operand.vmem [shape: f32[1,128], index: 5, kind: input, shape index: {}]   ;;  %s1886_s6 = inlined_call_operand.vmem [shape: f32[1,128], index: 6, kind: input, shape index: {}]   ;;  %s1887_s7 = inlined_call_operand.hbm [shape: f32[32,128], index: 7, kind: output, shape index: {}]  }
   0x1   :  { %13 = vsyncpa [#allocation7], 0 }
   0x2   :  { %14 = vsyncpa [#allocation5], 0  ;;  %s1581_s24 = smov [#allocation6]   ;;  %s1487_s28 = scalar_lea.hbm %s1881_s1, 3456 }
   0x3   :  { %s32_s25 = sshll.u32 %s1581_s24, 4  ;;  %p1488_p0 = scmp.ne.s32.totalorder %s1881_s1, %s1487_s28  ;;  %s33_s25 = int_to_ptr.vmem [resolvable:$true] %s32_s25 }
   0x4   :  { %p1491_p1 = scmp.lt.u32.totalorder %s1487_s28, %s1881_s1 }
   0x6   :  { %p1493_p2 = pnand %p1491_p1, %p1488_p0 }
   0x8   :  { %1496 = shalt.err (!%p1493_p2)
}
   0x9   :  { %s1497_s10 = scalar_lea.vmem %s33_s25, 3456  ;;  %p1502_p4 = scmp.lt.s32.totalorder %s33_s25, %s33_s25 }
   0xa   :  { %p1498_p3 = scmp.ne.s32.totalorder %s33_s25, %s1497_s10  ;;  %p1503_p5 = scmp.lt.s32.totalorder %s1497_s10, %s1497_s10 }
   0xc   :  { %p1504_p6 = por %p1503_p5, %p1502_p4 }
   0xe   :  { %p1505_p7 = pnand %p1504_p6, %p1498_p3 }
  0x10   :  { %1508 = shalt.err (!%p1505_p7)
}
  0x11   :  { %s1582_s11 = smov 64   ;;  %s1583_s12 = smov 4  }
  0x12   :  { %38 = dma.hbm_to_vmem [thread:$0]  %s1881_s1, 3456, %s33_s25, [#allocation7], %s1582_s11, %s1582_s11, %s1583_s12  }
  0x13   :  { %s1584_s15 = smov [#allocation3]   ;;  %s1509_s19 = scalar_lea.hbm %s1880_s0, 512 }
  0x14   :  { %s20_s16 = sshll.u32 %s1584_s15, 4  ;;  %p1510_p8 = scmp.ne.s32.totalorder %s1880_s0, %s1509_s19  ;;  %s21_s16 = int_to_ptr.vmem [resolvable:$true] %s20_s16 }
  0x15   :  { %p1513_p9 = scmp.lt.u32.totalorder %s1509_s19, %s1880_s0 }
  0x17   :  { %p1515_p10 = pnand %p1513_p9, %p1510_p8 }
  0x19   :  { %1518 = shalt.err (!%p1515_p10)
}
  0x1a   :  { %s1519_s24 = scalar_lea.vmem %s21_s16, 512  ;;  %p1524_p12 = scmp.lt.s32.totalorder %s21_s16, %s21_s16 }
  0x1b   :  { %p1520_p11 = scmp.ne.s32.totalorder %s21_s16, %s1519_s24  ;;  %p1525_p13 = scmp.lt.s32.totalorder %s1519_s24, %s1519_s24 }
  0x1d   :  { %p1526_p0 = por %p1525_p13, %p1524_p12 }
  0x1f   :  { %p1527_p1 = pnand %p1526_p0, %p1520_p11 }
  0x21   :  { %1530 = shalt.err (!%p1527_p1)
}
  0x22   :  { %s1585_s1 = smov 128   ;;  %s1586_s25 = smov 8  }
  0x23   :  { %26 = dma.hbm_to_vmem [thread:$0]  %s1880_s0, 512, %s21_s16, [#allocation4], %s1585_s1, %s1585_s1, %s1586_s25  }
  0x24   :  { %s1587_s28 = smov [#allocation8]   ;;  %s1531_s9 = scalar_lea.hbm %s1882_s2, 3456 }
  0x25   :  { %s44_s29 = sshll.u32 %s1587_s28, 4  ;;  %p1532_p2 = scmp.ne.s32.totalorder %s1882_s2, %s1531_s9  ;;  %s45_s29 = int_to_ptr.vmem [resolvable:$true] %s44_s29 }
  0x26   :  { %p1535_p3 = scmp.lt.u32.totalorder %s1531_s9, %s1882_s2 }
  0x28   :  { %p1537_p4 = pnand %p1535_p3, %p1532_p2 }
  0x2a   :  { %1540 = shalt.err (!%p1537_p4)
}
  0x2b   :  { %s1541_s17 = scalar_lea.vmem %s45_s29, 3456  ;;  %p1546_p6 = scmp.lt.s32.totalorder %s45_s29, %s45_s29 }
  0x2c   :  { %p1542_p5 = scmp.ne.s32.totalorder %s45_s29, %s1541_s17  ;;  %p1547_p7 = scmp.lt.s32.totalorder %s1541_s17, %s1541_s17 }
  0x2e   :  { %p1548_p8 = por %p1547_p7, %p1546_p6 }
  0x30   :  { %p1549_p9 = pnand %p1548_p8, %p1542_p5 }
  0x32   :  { %1552 = shalt.err (!%p1549_p9)
}
  0x33   :  { %50 = dma.hbm_to_vmem [thread:$0]  %s1882_s2, 3456, %s45_s29, [#allocation7], %s1582_s11, %s1582_s11, %s1583_s12  }
  0x34   :  { %1575 = dma.done.wait [#allocation4], 512  }
  0x35   :  { %1576 = vsyncadd [#allocation4], 4294966784 }
  0x36   :  { %1577 = dma.done.wait [#allocation7], 6912  }
  0x37   :  { %1578 = vsyncadd [#allocation7], 4294960384  ;;  %vm69_vm0 = vcmask 1043456   ;;  %vm70_vm1 = vcmask 130052   ;;  %v1588_v0 = vmov 0   ;;  %vm76_vm3 = vcmask 1041408  }
  0x38   :  { %231 = vmatprep.subr.bf16.mxu0 %v1588_v0  ;;  %359 = vmatprep.subr.bf16.mxu1 %v1588_v0  ;;  %vm71_vm2 = vmor %vm70_vm1, %vm69_vm0  ;;  %vm77_vm4 = vcmask 128004   ;;  %v1414_v1 = vld [vmem:[#allocation6] sm:$0xff]   ;;  %v1415_v2 = vld [vmem:[#allocation6 + $0x48] sm:$0xff]   ;;  %vm96_vm6 = vcmask 1040384   ;;  %vm97_vm7 = vcmask 1044484   ;;  %vm221_vm9 = vcmask 130048  }
  0x39   :  { %72 = vst.msk [vmem:[#allocation2] sm:$0xff] %vm71_vm2, %v1588_v0  ;;  %73 = vst.msk [vmem:[#allocation2 + $0x8] sm:$0xff] %vm71_vm2, %v1588_v0  ;;  %232 = vmatpush1.bf16.msra.mxu0 %v1414_v1  ;;  %v1416_v3 = vld [vmem:[#allocation6 + $0x8] sm:$0xff]   ;;  %360 = vmatpush1.bf16.msra.mxu1 %v1415_v2  ;;  %v1417_v4 = vld [vmem:[#allocation6 + $0x50] sm:$0xff]   ;;  %vm420_vm10 = vcmask 1045504   ;;  %s1589_s2 = smov 16  }
  0x3a   :  { %74 = vst.msk [vmem:[#allocation2 + $0x10] sm:$0xff] %vm71_vm2, %v1588_v0  ;;  %75 = vst.msk [vmem:[#allocation2 + $0x18] sm:$0xff] %vm71_vm2, %v1588_v0  ;;  %233 = vmatprep.subr.bf16.mxu0 %v1588_v0  ;;  %361 = vmatprep.subr.bf16.mxu1 %v1588_v0  ;;  %v1418_v5 = vld [vmem:[#allocation6 + $0x10] sm:$0xff]   ;;  %v1419_v6 = vld [vmem:[#allocation6 + $0x58] sm:$0xff]   ;;  %s1590_s12 = smov 32  }
  0x3b   :  { %vm78_vm5 = vmor %vm77_vm4, %vm76_vm3  ;;  %v1420_v7 = vld [vmem:[#allocation6 + $0x18] sm:$0xff]   ;;  %v1421_v8 = vld [vmem:[#allocation6 + $0x60] sm:$0xff]  }
  0x3c   :  { %79 = vst.msk [vmem:[#allocation2 + $0x20] sm:$0x33] %vm78_vm5, %v1588_v0  ;;  %v1422_v9 = vld [vmem:[#allocation6 + $0x20] sm:$0xff]   ;;  %v1423_v10 = vld [vmem:[#allocation6 + $0x68] sm:$0xff]   ;;  %v1425_v14 = vld [vmem:[#allocation6 + $0x70] sm:$0xff]  }
  0x3d   :  { %234 = vmatpush1.bf16.msra.mxu0 %v1416_v3  ;;  %362 = vmatpush1.bf16.msra.mxu1 %v1417_v4  ;;  %v1424_v11 = vld [vmem:[#allocation6 + $0x28] sm:$0xff]   ;;  %v80_v12 = vld [vmem:[#allocation3] sm:$0xff]  ;;  %vm1697_vm8 = vmor %vm96_vm6, %vm97_vm7 }
  0x3e   :  { %235 = vmatprep.subr.bf16.mxu0 %v1588_v0  ;;  %363 = vmatprep.subr.bf16.mxu1 %v1588_v0  ;;  %v81_v13 = vld [vmem:[#allocation3 + $0x8] sm:$0xff]  ;;  %v1394_v15 = vpack.c.bf16 %v80_v12, %v80_v12  ;;  %v82_v18 = vld [vmem:[#allocation3 + $0x10] sm:$0xff]  ;;  %v83_v22 = vld [vmem:[#allocation3 + $0x18] sm:$0xff] }
  0x3f   :  { %v1395_v16 = vpack.c.bf16 %v81_v13, %v81_v13  ;;  %v1426_v19 = vld [vmem:[#allocation6 + $0x30] sm:$0xff]   ;;  %v1396_v23 = vpack.c.bf16 %v82_v18, %v82_v18  ;;  %v1397_v24 = vpack.c.bf16 %v83_v22, %v83_v22  ;;  %v1427_v25 = vld [vmem:[#allocation6 + $0x78] sm:$0xff]   ;;  %v1429_v35 = vld [vmem:[#allocation6 + $0x80] sm:$0xff]  }
  0x40   :  { %v99_v20 = vrot.slane %v1394_v15, 7  ;;  %v1428_v33 = vld [vmem:[#allocation6 + $0x38] sm:$0xff]   ;;  %v1430_v37 = vld [vmem:[#allocation6 + $0x40] sm:$0xff]   ;;  %v1431_v38 = vld [vmem:[#allocation6 + $0x88] sm:$0xff]  }
  0x41   :  { %236 = vmatpush1.bf16.msra.mxu0 %v1418_v5  ;;  %364 = vmatpush1.bf16.msra.mxu1 %v1419_v6  ;;  %v101_v21 = vrot.slane %v1395_v16, 7  ;;  %v104_v28 = vrot.slane %v1396_v23, 7  ;;  %v107_v29 = vrot.slane %v1397_v24, 7  ;;  %v1434_v40 = vld [vmem:[#allocation6 + $0x90] sm:$0xff]   ;;  %v1432_v42 = vld [vmem:[#allocation2 + $0x4] ss:$8 sps:$4 sm:$0xff]  }
  0x42   :  { %237 = vmatprep.subr.bf16.mxu0 %v1588_v0  ;;  %365 = vmatprep.subr.bf16.mxu1 %v1588_v0  ;;  %v100_v26 = vrot.slane %v99_v20, 4  ;;  %115 = vst [vmem:[#allocation2] sm:$0xe] %v99_v20  ;;  %v1436_v44 = vld [vmem:[#allocation2 + $0x14] ss:$8 sps:$4 sm:$0xff]   ;;  %v1435_v45 = vld [vmem:[#allocation6 + $0x98] sm:$0xff]  }
  0x43   :  { %v103_v27 = vrot.slane %v101_v21, 4  ;;  %v106_v32 = vrot.slane %v104_v28, 4  ;;  %v109_v34 = vrot.slane %v107_v29, 4  ;;  %1321 = vmatprep.mubr.msk.bf16.mxu0 %vm221_vm9, %v1432_v42  ;;  %1333 = vmatprep.mubr.msk.bf16.mxu1 %vm221_vm9, %v1432_v42  ;;  %v1439_v48 = vld [vmem:[#allocation6 + $0xa0] sm:$0xff]   ;;  %v1440_v50 = vld [vmem:[#allocation6 + $0xa8] sm:$0xff]   ;;  %v1443_v52 = vld [vmem:[#allocation6 + $0xb0] sm:$0xff]  }
  0x44   :  { %v102_v30 = vsel %vm1697_vm8, %v100_v26, %v101_v21  ;;  %v1444_v53 = vld [vmem:[#allocation6 + $0xb8] sm:$0xff]   ;;  %v1445_v54 = vld [vmem:[#allocation6 + $0xc0] sm:$0xff]   ;;  %v1446_v55 = vld [vmem:[#allocation6 + $0xc8] sm:$0xff]  }
  0x45   :  { %238 = vmatpush1.bf16.msra.mxu0 %v1420_v7  ;;  %366 = vmatpush1.bf16.msra.mxu1 %v1421_v8  ;;  %v105_v31 = vsel %vm1697_vm8, %v103_v27, %v104_v28  ;;  %116 = vst [vmem:[#allocation2 + $0x8] sm:$0xf] %v102_v30  ;;  %v108_v36 = vsel %vm1697_vm8, %v106_v32, %v107_v29  ;;  %119 = vst [vmem:[#allocation2 + $0x20] sm:$0x1] %v109_v34  ;;  %v1447_v56 = vld [vmem:[#allocation6 + $0xd0] sm:$0xff]  }
  0x46   :  { %239 = vmatprep.subr.bf16.mxu0 %v1588_v0  ;;  %367 = vmatprep.subr.bf16.mxu1 %v1588_v0  ;;  %117 = vst [vmem:[#allocation2 + $0x10] sm:$0xf] %v105_v31  ;;  %118 = vst [vmem:[#allocation2 + $0x18] sm:$0xf] %v108_v36 }
  0x49   :  { %240 = vmatpush1.bf16.msra.mxu0 %v1422_v9  ;;  %368 = vmatpush1.bf16.msra.mxu1 %v1423_v10  ;;  %v120_v39 = vld [vmem:[#allocation2] sm:$0xff] }
  0x4a   :  { %241 = vmatprep.subr.bf16.mxu0 %v1588_v0  ;;  %369 = vmatprep.subr.bf16.mxu1 %v1588_v0 }
  0x4c   :  { %v121_v41 = vld [vmem:[#allocation2 + $0x8] sm:$0xff]  ;;  %v124_v46 = vld [vmem:[#allocation2 + $0x20] sm:$0x33] }
  0x4d   :  { %242 = vmatpush1.bf16.msra.mxu0 %v1424_v11  ;;  %370 = vmatpush1.bf16.msra.mxu1 %v1425_v14  ;;  %v1306_v43 = vcombine.low %v120_v39, %v121_v41  ;;  %v1438_v47 = vld [vmem:[#allocation2 + $0x10] ss:$8 sps:$4 sm:$0xff]   ;;  %v1311_v49 = vcombine.high %v124_v46, %v124_v46  ;;  %v1310_v51 = vcombine.low %v124_v46, %v124_v46 }
  0x4e   :  { %243 = vmatprep.subr.bf16.mxu0 %v1588_v0  ;;  %371 = vmatprep.subr.bf16.mxu1 %v1588_v0 }
  0x51   :  { %244 = vmatpush1.bf16.msra.mxu0 %v1426_v19  ;;  %372 = vmatpush1.bf16.msra.mxu1 %v1427_v25 }
  0x52   :  { %245 = vmatprep.subr.bf16.mxu0 %v1588_v0  ;;  %373 = vmatprep.subr.bf16.mxu1 %v1588_v0 }
  0x55   :  { %246 = vmatpush1.bf16.msra.mxu0 %v1428_v33  ;;  %374 = vmatpush1.bf16.msra.mxu1 %v1429_v35 }
  0x56   :  { %247 = vmatprep.subr.bf16.mxu0 %v1588_v0  ;;  %375 = vmatprep.subr.bf16.mxu1 %v1588_v0 }
  0x59   :  { %248 = vmatpush1.bf16.msra.mxu0 %v1430_v37  ;;  %376 = vmatpush1.bf16.msra.mxu1 %v1431_v38 }
  0x5a   :  { %511 = vmatprep.subr.bf16.mxu0 %v1588_v0  ;;  %830 = vmatprep.subr.bf16.mxu1 %v1588_v0 }
  0x5c   :  { %264 = vmatmul.mubr.bf16.vlgmr.msra.gmra.mrb[0].mxu0 %v1306_v43  ;;  %392 = vmatmul.mubr.bf16.vlgmr.msra.gmra.mrb[0].mxu1 %v1306_v43 }
  0x5d   :  { %512 = vmatpush1.bf16.msra.mxu0 %v1434_v40  ;;  %1334 = vmatprep.mubr.msk.bf16.mxu1 %vm221_vm9, %v1436_v44 }
  0x5e   :  { %513 = vmatprep.subr.bf16.mxu0 %v1588_v0  ;;  %1322 = vmatprep.mubr.msk.bf16.mxu0 %vm221_vm9, %v1436_v44 }
  0x61   :  { %514 = vmatpush1.bf16.msra.mxu0 %v1435_v45 }
  0x62   :  { %515 = vmatprep.subr.bf16.mxu0 %v1588_v0 }
  0x64   :  { %272 = vmatmul.mubr.bf16.gmra.mrb[4].mxu0 %v1438_v47  ;;  %400 = vmatmul.mubr.bf16.gmra.mrb[4].mxu1 %v1438_v47 }
  0x65   :  { %516 = vmatpush1.bf16.msra.mxu0 %v1439_v48  ;;  %1335 = vmatprep.mubr.msk.bf16.mxu1 %vm221_vm9, %v1311_v49 }
  0x66   :  { %517 = vmatprep.subr.bf16.mxu0 %v1588_v0  ;;  %1323 = vmatprep.mubr.msk.bf16.mxu0 %vm221_vm9, %v1311_v49 }
  0x69   :  { %518 = vmatpush1.bf16.msra.mxu0 %v1440_v50 }
  0x6a   :  { %519 = vmatprep.subr.bf16.mxu0 %v1588_v0 }
  0x6c   :  { %280 = vmatmul.mubr.bf16.gmra.mrb[8].mxu0 %v1310_v51  ;;  %408 = vmatmul.mubr.bf16.gmra.mrb[8].mxu1 %v1310_v51 }
  0x6d   :  { %520 = vmatpush1.bf16.msra.mxu0 %v1443_v52  ;;  %1345 = vmatprep.mubr.msk.bf16.mxu0 %vm221_vm9, %v1432_v42 }
  0x6e   :  { %521 = vmatprep.subr.bf16.mxu0 %v1588_v0 }
  0x71   :  { %522 = vmatpush1.bf16.msra.mxu0 %v1444_v53 }
  0x72   :  { %523 = vmatprep.subr.bf16.mxu0 %v1588_v0 }
  0x75   :  { %524 = vmatpush1.bf16.msra.mxu0 %v1445_v54 }
  0x76   :  { %525 = vmatprep.subr.bf16.mxu0 %v1588_v0 }
  0x79   :  { %526 = vmatpush1.bf16.msra.mxu0 %v1446_v55 }
  0x7a   :  { %527 = vmatprep.subr.bf16.mxu0 %v1588_v0 }
  0x7d   :  { %528 = vmatpush1.bf16.msra.mxu0 %v1447_v56 }
  0x7e   :  { %958 = vmatprep.subr.bf16.mxu0 %v1588_v0 }
  0x80   :  { %544 = vmatmul.mubr.bf16.vlgmr.msra.gmra.mrb[12].mxu0 %v1306_v43 }
  0x81   :  { %1346 = vmatprep.mubr.msk.bf16.mxu0 %vm221_vm9, %v1436_v44 }
  0x88   :  { %552 = vmatmul.mubr.bf16.gmra.mrb[16].mxu0 %v1438_v47 }
  0x89   :  { %1347 = vmatprep.mubr.msk.bf16.mxu0 %vm221_vm9, %v1311_v49 }
  0x90   :  { %560 = vmatmul.mubr.bf16.gmra.mrb[20].mxu0 %v1310_v51 }
 0x12f   :  { %v265_v57 = vpop.f32.mrb[0].mxu0  ;;  %v393_v58 = vpop.f32.mrb[0].mxu1 }
 0x130   :  { %v267_v59 = vpop.f32.mrb[1].mxu0  ;;  %v421_v60 = vrot.slane %v393_v58, 2  ;;  %v395_v61 = vpop.f32.mrb[1].mxu1 }
 0x131   :  { %v268_v62 = vpop.f32.mrb[2].mxu0  ;;  %v396_v63 = vpop.f32.mrb[2].mxu1 }
 0x132   :  { %v270_v1 = vpop.f32.mrb[3].mxu0  ;;  %v422_v2 = vrot.slane %v396_v63, 2  ;;  %v398_v3 = vpop.f32.mrb[3].mxu1 }
 0x134   :  { %v423_v4 = vsel %vm420_vm10, %v421_v60, %v422_v2 }
 0x135   :  { %v434_v5 = vadd.f32 %v423_v4, %v265_v57 }
 0x137   :  { %v273_v6 = vpop.f32.mrb[4].mxu0  ;;  %v401_v7 = vpop.f32.mrb[4].mxu1 }
 0x138   :  { %v275_v8 = vpop.f32.mrb[5].mxu0  ;;  %v424_v9 = vrot.slane %v401_v7, 2  ;;  %v403_v10 = vpop.f32.mrb[5].mxu1 }
 0x139   :  { %v276_v11 = vpop.f32.mrb[6].mxu0  ;;  %v404_v12 = vpop.f32.mrb[6].mxu1 }
 0x13a   :  { %v278_v13 = vpop.f32.mrb[7].mxu0  ;;  %v425_v14 = vsel %vm420_vm10, %v422_v2, %v424_v9  ;;  %v426_v15 = vrot.slane %v404_v12, 2  ;;  %v406_v16 = vpop.f32.mrb[7].mxu1 }
 0x13b   :  { %v435_v18 = vadd.f32 %v425_v14, %v268_v62 }
 0x13c   :  { %v427_v19 = vsel %vm420_vm10, %v424_v9, %v426_v15 }
 0x13d   :  { %v436_v20 = vadd.f32 %v427_v19, %v273_v6 }
 0x13f   :  { %v281_v21 = vpop.f32.mrb[8].mxu0  ;;  %v409_v22 = vpop.f32.mrb[8].mxu1 }
 0x140   :  { %v282_v23 = vpop.f32.mrb[9].mxu0  ;;  %v428_v24 = vrot.slane %v409_v22, 2  ;;  %v411_v26 = vpop.f32.mrb[9].mxu1 }
 0x141   :  { %v283_v25 = vpop.f32.mrb[10].mxu0  ;;  %v412_v28 = vpop.f32.mrb[10].mxu1  ;;  %v1450_v26 = vld [vmem:[#allocation8 + $0x8] sm:$0xff]  }
 0x142   :  { %v284_v27 = vpop.f32.mrb[11].mxu0  ;;  %v429_v29 = vsel %vm420_vm10, %v426_v15, %v428_v24  ;;  %v413_v30 = vpop.f32.mrb[11].mxu1  ;;  %v1448_v24 = vld [vmem:[#allocation8] sm:$0xff]   ;;  %v1449_v25 = vld [vmem:[#allocation8 + $0x48] sm:$0xff]   ;;  %v1452_v28 = vld [vmem:[#allocation8 + $0x10] sm:$0xff]  }
 0x143   :  { %v437_v31 = vadd.f32 %v429_v29, %v276_v11  ;;  %831 = vmatpush1.bf16.msra.mxu1 %v1448_v24  ;;  %959 = vmatpush1.bf16.msra.mxu0 %v1449_v25  ;;  %v1451_v27 = vld [vmem:[#allocation8 + $0x50] sm:$0xff]   ;;  %v1453_v29 = vld [vmem:[#allocation8 + $0x58] sm:$0xff]  }
 0x144   :  { %832 = vmatprep.subr.bf16.mxu1 %v1588_v0  ;;  %960 = vmatprep.subr.bf16.mxu0 %v1588_v0  ;;  %v1454_v30 = vld [vmem:[#allocation8 + $0x18] sm:$0xff]  }
 0x147   :  { %833 = vmatpush1.bf16.msra.mxu1 %v1450_v26  ;;  %961 = vmatpush1.bf16.msra.mxu0 %v1451_v27 }
 0x148   :  { %834 = vmatprep.subr.bf16.mxu1 %v1588_v0  ;;  %962 = vmatprep.subr.bf16.mxu0 %v1588_v0 }
 0x14b   :  { %835 = vmatpush1.bf16.msra.mxu1 %v1452_v28  ;;  %963 = vmatpush1.bf16.msra.mxu0 %v1453_v29 }
 0x14c   :  { %836 = vmatprep.subr.bf16.mxu1 %v1588_v0  ;;  %964 = vmatprep.subr.bf16.mxu0 %v1588_v0 }
 0x14f   :  { %837 = vmatpush1.bf16.msra.mxu1 %v1454_v30 }
 0x150   :  { %838 = vmatprep.subr.bf16.mxu1 %v1588_v0 }
 0x153   :  { %v545_v32 = vpop.f32.mrb[12].mxu0 }
 0x154   :  { %v547_v33 = vpop.f32.mrb[13].mxu0  ;;  %v572_v35 = vrot.slane %v545_v32, 4  ;;  %v1456_v32 = vld [vmem:[#allocation8 + $0x20] sm:$0xff]  }
 0x155   :  { %v548_v34 = vpop.f32.mrb[14].mxu0  ;;  %v1457_v33 = vld [vmem:[#allocation8 + $0x68] sm:$0xff]   ;;  %839 = vmatpush1.bf16.msra.mxu1 %v1456_v32 }
 0x156   :  { %v573_v36 = vrot.slane %v548_v34, 4  ;;  %v550_v37 = vpop.f32.mrb[15].mxu0  ;;  %840 = vmatprep.subr.bf16.mxu1 %v1588_v0  ;;  %v1458_v34 = vld [vmem:[#allocation8 + $0x28] sm:$0xff]  }
 0x157   :  { %v1461_v37 = vld [vmem:[#allocation8 + $0x78] sm:$0xff]  }
 0x158   :  { %v574_v38 = vsel %vm69_vm0, %v572_v35, %v573_v36  ;;  %v1459_v35 = vld [vmem:[#allocation8 + $0x70] sm:$0xff]  }
 0x159   :  { %v1738_v39 = vadd.f32 %v574_v38, %v434_v5  ;;  %841 = vmatpush1.bf16.msra.mxu1 %v1458_v34  ;;  %v1462_v38 = vld [vmem:[#allocation8 + $0x38] sm:$0xff]  }
 0x15a   :  { %842 = vmatprep.subr.bf16.mxu1 %v1588_v0 }
 0x15b   :  { %v553_v40 = vpop.f32.mrb[16].mxu0  ;;  %v600_v51 = vmul.f32 %v1738_v39, %v1738_v39 }
 0x15c   :  { %v575_v41 = vrot.slane %v553_v40, 4  ;;  %v555_v42 = vpop.f32.mrb[17].mxu0  ;;  %v1463_v40 = vld [vmem:[#allocation8 + $0x80] sm:$0xff]  }
 0x15d   :  { %v556_v43 = vpop.f32.mrb[18].mxu0  ;;  %v1465_v42 = vld [vmem:[#allocation8 + $0x88] sm:$0xff]  }
 0x15e   :  { %v576_v44 = vsel %vm69_vm0, %v573_v36, %v575_v41  ;;  %v577_v45 = vrot.slane %v556_v43, 4  ;;  %v558_v46 = vpop.f32.mrb[19].mxu0  ;;  %v1460_v36 = vld [vmem:[#allocation8 + $0x30] sm:$0xff]  }
 0x15f   :  { %v1741_v47 = vadd.f32 %v576_v44, %v435_v18  ;;  %843 = vmatpush1.bf16.msra.mxu1 %v1460_v36  ;;  %v1469_v36 = vld [vmem:[#allocation8 + $0x90] sm:$0xff]  }
 0x160   :  { %v578_v48 = vsel %vm69_vm0, %v575_v41, %v577_v45  ;;  %844 = vmatprep.subr.bf16.mxu1 %v1588_v0  ;;  %v1464_v41 = vld [vmem:[#allocation8 + $0x40] sm:$0xff]  }
 0x161   :  { %v601_v49 = vmul.f32 %v1741_v47, %v1741_v47  ;;  %v1746_v50 = vadd.f32 %v578_v48, %v436_v20  ;;  %v591_v52 = vadd.f32 %v1741_v47, %v1738_v39 }
 0x163   :  { %v561_v53 = vpop.f32.mrb[20].mxu0  ;;  %v604_v56 = vadd.f32 %v601_v49, %v600_v51  ;;  %v602_v57 = vmul.f32 %v1746_v50, %v1746_v50  ;;  %v592_v61 = vadd.f32 %v591_v52, %v1746_v50  ;;  %845 = vmatpush1.bf16.msra.mxu1 %v1462_v38  ;;  %v1591_v52 = vmov 1966171168   ;;  %v1468_v38 = vld [vmem:[#allocation2 + $0x4] ss:$8 sps:$4 sm:$0xff]  }
 0x164   :  { %v579_v54 = vrot.slane %v561_v53, 4  ;;  %v563_v55 = vpop.f32.mrb[21].mxu0  ;;  %846 = vmatprep.subr.bf16.mxu1 %v1588_v0  ;;  %v637_v53 = vunpack.c.l.s4 %v1591_v52  ;;  %1367 = vmatprep.mubr.msk.bf16.mxu1 %vm221_vm9, %v1468_v38  ;;  %v1481_v52 = vld [vmem:[#allocation8 + $0xc8] sm:$0xff]  }
 0x165   :  { %v564_v58 = vpop.f32.mrb[22].mxu0  ;;  %v605_v63 = vadd.f32 %v604_v56, %v602_v57  ;;  %1379 = vmatprep.mubr.msk.bf16.mxu0 %vm221_vm9, %v1468_v38 }
 0x166   :  { %v580_v59 = vsel %vm69_vm0, %v577_v45, %v579_v54  ;;  %v565_v60 = vpop.f32.mrb[23].mxu0  ;;  %v639_v54 = vlaneseq  ;;  %v638_v55 = vunpack.c.0.s8 %v637_v53  ;;  %v1482_v53 = vld [vmem:[#allocation8 + $0xd0] sm:$0xff]  }
 0x167   :  { %v1756_v62 = vadd.f32 %v580_v59, %v437_v31  ;;  %v1455_v31 = vld [vmem:[#allocation8 + $0x60] sm:$0xff]   ;;  %847 = vmatpush1.bf16.msra.mxu1 %v1464_v41  ;;  %v1472_v41 = vld [vmem:[#allocation8 + $0x98] sm:$0xff]  }
 0x168   :  { %965 = vmatpush1.bf16.msra.mxu0 %v1455_v31  ;;  %1109 = vmatprep.subr.bf16.mxu1 %v1588_v0  ;;  %v640_v56 = vshrl.u32 %v639_v54, 7 }
 0x169   :  { %v593_v1 = vadd.f32 %v592_v61, %v1756_v62  ;;  %v603_v2 = vmul.f32 %v1756_v62, %v1756_v62  ;;  %966 = vmatprep.subr.bf16.mxu0 %v1588_v0  ;;  %v589_v61 = vld [vmem:[%s1883_s3] sm:$0x1] }
 0x16a   :  { %v1783_v57 = vsub.s32 %v638_v55, %v640_v56 }
 0x16b   :  { %v594_v3 = vrot.slane %v593_v1, 4  ;;  %v606_v4 = vadd.f32 %v605_v63, %v603_v2  ;;  %v1789_v63 = vsub.s32 0, %v640_v56 }
 0x16c   :  { %967 = vmatpush1.bf16.msra.mxu0 %v1457_v33 }
 0x16d   :  { %v595_v5 = vadd.f32 %v594_v3, %v593_v1  ;;  %v607_v6 = vrot.slane %v606_v4, 4  ;;  %968 = vmatprep.subr.bf16.mxu0 %v1588_v0  ;;  %v590_v3 = vld [vmem:[%s1884_s4] sm:$0x1] }
 0x16f   :  { %v596_v7 = vrot.slane %v595_v5, 2  ;;  %v608_v8 = vadd.f32 %v607_v6, %v606_v4 }
 0x170   :  { %969 = vmatpush1.bf16.msra.mxu0 %v1459_v35 }
 0x171   :  { %v597_v9 = vadd.f32 %v596_v7, %v595_v5  ;;  %v609_v10 = vrot.slane %v608_v8, 2  ;;  %970 = vmatprep.subr.bf16.mxu0 %v1588_v0 }
 0x173   :  { %v598_v11 = vrot.slane %v597_v9, 1  ;;  %v610_v12 = vadd.f32 %v609_v10, %v608_v8 }
 0x174   :  { %971 = vmatpush1.bf16.msra.mxu0 %v1461_v37 }
 0x175   :  { %v611_v13 = vrot.slane %v610_v12, 1  ;;  %v599_v14 = vadd.f32 %v598_v11, %v597_v9  ;;  %972 = vmatprep.subr.bf16.mxu0 %v1588_v0 }
 0x177   :  { %v612_v15 = vadd.f32 %v611_v13, %v610_v12 }
 0x178   :  { %973 = vmatpush1.bf16.msra.mxu0 %v1463_v40  ;;  %v1470_v40 = vld [vmem:[#allocation2 + $0x14] ss:$8 sps:$4 sm:$0xff]  }
 0x179   :  { %v614_v16 = vsel %vm96_vm6, %v599_v14, %v612_v15  ;;  %974 = vmatprep.subr.bf16.mxu0 %v1588_v0 }
 0x17a   :  { %615 = vrot.lane.b32.xlu0 %v614_v16, %s1586_s25 }
 0x17c   :  { %975 = vmatpush1.bf16.msra.mxu0 %v1465_v42  ;;  %v1474_v42 = vld [vmem:[#allocation8 + $0xa0] sm:$0xff]  }
 0x1ec   :  { %v616_v18 = vpop.permute.xlu0 %615 }
 0x1ed   :  { %v617_v19 = vadd.f32 %v616_v18, %v614_v16 }
 0x1ef   :  { %618 = vrot.lane.b32.xlu0 %v617_v19, %s1589_s2 }
 0x261   :  { %v619_v20 = vpop.permute.xlu0 %618 }
 0x262   :  { %v620_v21 = vadd.f32 %v619_v20, %v617_v19 }
 0x264   :  { %621 = vrot.lane.b32.xlu1 %v620_v21, %s1590_s12 }
 0x2d6   :  { %v622_v22 = vpop.permute.xlu1 %621 }
 0x2d7   :  { %v623_v23 = vadd.f32 %v622_v22, %v620_v21 }
 0x2d9   :  { %624 = vrot.lane.b32.xlu1 %v623_v23, %s1582_s11 }
 0x34b   :  { %v625_v43 = vpop.permute.xlu1 %624 }
 0x34c   :  { %v626_v44 = vadd.f32 %v625_v43, %v623_v23 }
 0x34e   :  { %v627_v45 = vmul.f32 0.001953125, %v626_v44 }
 0x350   :  { %v628_v46 = vmul.f32 %v627_v45, %v627_v45 }
 0x352   :  { %v630_v48 = vrot.slane %v628_v46, 7  ;;  %v1478_v46 = vld [vmem:[#allocation8 + $0xb0] sm:$0xff]  }
 0x354   :  { %v632_v49 = vsub.f32 %v627_v45, %v630_v48 }
 0x356   :  { %v633_v51 = vadd.f32 1e-05, %v632_v49  ;;  %v1479_v49 = vld [vmem:[#allocation8 + $0xb8] sm:$0xff]  }
 0x358   :  { %1483 = vrsqrt.f32 %v633_v51  ;;  %v1480_v51 = vld [vmem:[#allocation8 + $0xc0] sm:$0xff]  }
 0x362   :  { %v1484_v58 = vpop.eup %1483 }
 0x363   :  { %v642_v59 = vrot.slane %v1484_v58, %v1783_v57 }
 0x365   :  { %v643_v60 = vcombine.high %v642_v59, %v642_v59 }
 0x367   :  { %v650_v1 = vrot.slane %v643_v60, %v1783_v57 }
 0x369   :  { %v652_v2 = vmul.f32 %v650_v1, %v589_v61 }
 0x36b   :  { %v653_v4 = vmul.f32 %v652_v2, %v627_v45  ;;  %v659_v5 = vrot.slane %v652_v2, %v1789_v63  ;;  %v1476_v45 = vld [vmem:[#allocation8 + $0xa8] sm:$0xff]  }
 0x36d   :  { %v654_v6 = vsub.f32 %v590_v3, %v653_v4  ;;  %v661_v7 = vmul.f32 %v659_v5, %v1738_v39  ;;  %v662_v8 = vmul.f32 %v659_v5, %v1741_v47  ;;  %v663_v9 = vmul.f32 %v659_v5, %v1746_v50 }
 0x36e   :  { %v664_v10 = vmul.f32 %v659_v5, %v1756_v62 }
 0x36f   :  { %v669_v11 = vrot.slane %v654_v6, %v1789_v63 }
 0x371   :  { %v671_v12 = vadd.f32 %v669_v11, %v661_v7  ;;  %v672_v13 = vadd.f32 %v669_v11, %v662_v8  ;;  %v673_v14 = vadd.f32 %v669_v11, %v663_v9  ;;  %v674_v15 = vadd.f32 %v669_v11, %v664_v10 }
 0x373   :  { %vm675_vm11 = vcmp.gt.f32.partialorder %v671_v12, 0.0  ;;  %vm676_vm12 = vcmp.gt.f32.partialorder %v672_v13, 0.0  ;;  %vm677_vm13 = vcmp.gt.f32.partialorder %v673_v14, 0.0  ;;  %vm678_vm14 = vcmp.gt.f32.partialorder %v674_v15, 0.0 }
 0x374   :  { %v679_v16 = vmul.f32 0.01, %v671_v12  ;;  %v680_v18 = vmul.f32 0.01, %v672_v13  ;;  %v681_v19 = vmul.f32 0.01, %v673_v14 }
 0x375   :  { %v682_v39 = vmul.f32 0.01, %v674_v15 }
 0x376   :  { %v683_v20 = vsel %vm675_vm11, %v671_v12, %v679_v16  ;;  %v684_v47 = vsel %vm676_vm12, %v672_v13, %v680_v18  ;;  %v685_v21 = vsel %vm677_vm13, %v673_v14, %v681_v19 }
 0x377   :  { %v686_v50 = vsel %vm678_vm14, %v674_v15, %v682_v39  ;;  %v1398_v22 = vpack.c.bf16 %v683_v20, %v683_v20  ;;  %v1399_v62 = vpack.c.bf16 %v684_v47, %v684_v47  ;;  %v1400_v23 = vpack.c.bf16 %v685_v21, %v685_v21 }
 0x378   :  { %v1401_v24 = vpack.c.bf16 %v686_v50, %v686_v50 }
 0x379   :  { %v699_v25 = vrot.slane %v1398_v22, 7  ;;  %v701_v26 = vrot.slane %v1399_v62, 7  ;;  %v704_v27 = vrot.slane %v1400_v23, 7 }
 0x37a   :  { %v707_v28 = vrot.slane %v1401_v24, 7 }
 0x37b   :  { %v700_v29 = vrot.slane %v699_v25, 4  ;;  %v703_v30 = vrot.slane %v701_v26, 4  ;;  %v706_v31 = vrot.slane %v704_v27, 4  ;;  %715 = vst [vmem:[#allocation2] sm:$0xe] %v699_v25 }
 0x37c   :  { %v709_v32 = vrot.slane %v707_v28, 4 }
 0x37d   :  { %v702_v33 = vsel %vm1697_vm8, %v700_v29, %v701_v26  ;;  %v705_v34 = vsel %vm1697_vm8, %v703_v30, %v704_v27  ;;  %v708_v35 = vsel %vm1697_vm8, %v706_v31, %v707_v28 }
 0x37e   :  { %716 = vst [vmem:[#allocation2 + $0x8] sm:$0xf] %v702_v33  ;;  %717 = vst [vmem:[#allocation2 + $0x10] sm:$0xf] %v705_v34 }
 0x37f   :  { %718 = vst [vmem:[#allocation2 + $0x18] sm:$0xf] %v708_v35  ;;  %719 = vst [vmem:[#allocation2 + $0x20] sm:$0x1] %v709_v32 }
 0x385   :  { %v1466_v37 = vld [vmem:[#allocation2] ss:$8 sps:$4 sm:$0xff]  }
 0x386   :  { %863 = vmatmul.mubr.bf16.vlgmr.msra.gmra.mrb[12].mxu1 %v1466_v37  ;;  %991 = vmatmul.mubr.bf16.vlgmr.msra.gmra.mrb[24].mxu0 %v1466_v37  ;;  %v724_v17 = vld [vmem:[#allocation2 + $0x20] sm:$0x33]  ;;  %v1473_v43 = vld [vmem:[#allocation2 + $0x10] ss:$8 sps:$4 sm:$0xff]  }
 0x387   :  { %1110 = vmatpush1.bf16.msra.mxu1 %v1469_v36  ;;  %1368 = vmatprep.mubr.msk.bf16.mxu1 %vm221_vm9, %v1470_v40  ;;  %v1357_v44 = vcombine.high %v724_v17, %v724_v17  ;;  %v1356_v48 = vcombine.low %v724_v17, %v724_v17 }
 0x388   :  { %1380 = vmatprep.mubr.msk.bf16.mxu0 %vm221_vm9, %v1470_v40  ;;  %1111 = vmatprep.subr.bf16.mxu1 %v1588_v0 }
 0x38b   :  { %1112 = vmatpush1.bf16.msra.mxu1 %v1472_v41 }
 0x38c   :  { %1113 = vmatprep.subr.bf16.mxu1 %v1588_v0 }
 0x38e   :  { %871 = vmatmul.mubr.bf16.gmra.mrb[16].mxu1 %v1473_v43  ;;  %999 = vmatmul.mubr.bf16.gmra.mrb[28].mxu0 %v1473_v43 }
 0x38f   :  { %1114 = vmatpush1.bf16.msra.mxu1 %v1474_v42  ;;  %1369 = vmatprep.mubr.msk.bf16.mxu1 %vm221_vm9, %v1357_v44 }
 0x390   :  { %1381 = vmatprep.mubr.msk.bf16.mxu0 %vm221_vm9, %v1357_v44  ;;  %1115 = vmatprep.subr.bf16.mxu1 %v1588_v0 }
 0x393   :  { %1116 = vmatpush1.bf16.msra.mxu1 %v1476_v45 }
 0x394   :  { %1117 = vmatprep.subr.bf16.mxu1 %v1588_v0 }
 0x396   :  { %879 = vmatmul.mubr.bf16.gmra.mrb[20].mxu1 %v1356_v48  ;;  %1007 = vmatmul.mubr.bf16.gmra.mrb[32].mxu0 %v1356_v48 }
 0x397   :  { %1118 = vmatpush1.bf16.msra.mxu1 %v1478_v46  ;;  %1391 = vmatprep.mubr.msk.bf16.mxu1 %vm221_vm9, %v1468_v38 }
 0x398   :  { %1119 = vmatprep.subr.bf16.mxu1 %v1588_v0 }
 0x39b   :  { %1120 = vmatpush1.bf16.msra.mxu1 %v1479_v49 }
 0x39c   :  { %1121 = vmatprep.subr.bf16.mxu1 %v1588_v0 }
 0x39f   :  { %1122 = vmatpush1.bf16.msra.mxu1 %v1480_v51 }
 0x3a0   :  { %1123 = vmatprep.subr.bf16.mxu1 %v1588_v0 }
 0x3a3   :  { %1124 = vmatpush1.bf16.msra.mxu1 %v1481_v52 }
 0x3a4   :  { %1125 = vmatprep.subr.bf16.mxu1 %v1588_v0 }
 0x3a7   :  { %1126 = vmatpush1.bf16.msra.mxu1 %v1482_v53 }
 0x3aa   :  { %1142 = vmatmul.mubr.bf16.vlgmr.msra.gmra.mrb[24].mxu1 %v1466_v37 }
 0x3ab   :  { %1392 = vmatprep.mubr.msk.bf16.mxu1 %vm221_vm9, %v1470_v40 }
 0x3b2   :  { %1150 = vmatmul.mubr.bf16.gmra.mrb[28].mxu1 %v1473_v43 }
 0x3b3   :  { %1393 = vmatprep.mubr.msk.bf16.mxu1 %vm221_vm9, %v1357_v44 }
 0x3ba   :  { %1158 = vmatmul.mubr.bf16.gmra.mrb[32].mxu1 %v1356_v48 }
 0x459   :  { %v864_v54 = vpop.f32.mrb[12].mxu1  ;;  %v992_v55 = vpop.f32.mrb[24].mxu0 }
 0x45a   :  { %v866_v56 = vpop.f32.mrb[13].mxu1  ;;  %v994_v58 = vpop.f32.mrb[25].mxu0  ;;  %v1019_v61 = vrot.slane %v992_v55, 2 }
 0x45b   :  { %v867_v59 = vpop.f32.mrb[14].mxu1  ;;  %v995_v60 = vpop.f32.mrb[26].mxu0 }
 0x45c   :  { %v1020_v1 = vrot.slane %v995_v60, 2  ;;  %v869_v2 = vpop.f32.mrb[15].mxu1  ;;  %v997_v3 = vpop.f32.mrb[27].mxu0 }
 0x45e   :  { %v1021_v0 = vsel %vm420_vm10, %v1019_v61, %v1020_v1 }
 0x45f   :  { %v1032_v4 = vadd.f32 %v1021_v0, %v864_v54 }
 0x461   :  { %v872_v5 = vpop.f32.mrb[16].mxu1  ;;  %v1000_v6 = vpop.f32.mrb[28].mxu0 }
 0x462   :  { %v1022_v7 = vrot.slane %v1000_v6, 2  ;;  %v874_v8 = vpop.f32.mrb[17].mxu1  ;;  %v1002_v9 = vpop.f32.mrb[29].mxu0 }
 0x463   :  { %v875_v10 = vpop.f32.mrb[18].mxu1  ;;  %v1003_v11 = vpop.f32.mrb[30].mxu0 }
 0x464   :  { %v1023_v12 = vsel %vm420_vm10, %v1020_v1, %v1022_v7  ;;  %v1024_v13 = vrot.slane %v1003_v11, 2  ;;  %v877_v14 = vpop.f32.mrb[19].mxu1  ;;  %v1005_v15 = vpop.f32.mrb[31].mxu0 }
 0x465   :  { %v1033_v16 = vadd.f32 %v1023_v12, %v867_v59 }
 0x466   :  { %v1025_v18 = vsel %vm420_vm10, %v1022_v7, %v1024_v13 }
 0x467   :  { %v1034_v19 = vadd.f32 %v1025_v18, %v872_v5 }
 0x469   :  { %v880_v39 = vpop.f32.mrb[20].mxu1  ;;  %v1008_v20 = vpop.f32.mrb[32].mxu0 }
 0x46a   :  { %v1026_v47 = vrot.slane %v1008_v20, 2  ;;  %v881_v21 = vpop.f32.mrb[21].mxu1  ;;  %v1010_v50 = vpop.f32.mrb[33].mxu0 }
 0x46b   :  { %v882_v22 = vpop.f32.mrb[22].mxu1  ;;  %v1011_v62 = vpop.f32.mrb[34].mxu0 }
 0x46c   :  { %v1027_v23 = vsel %vm420_vm10, %v1024_v13, %v1026_v47  ;;  %v883_v24 = vpop.f32.mrb[23].mxu1  ;;  %v1012_v25 = vpop.f32.mrb[35].mxu0 }
 0x46d   :  { %v1035_v26 = vadd.f32 %v1027_v23, %v875_v10 }
 0x47d   :  { %v1143_v27 = vpop.f32.mrb[24].mxu1 }
 0x47e   :  { %v1145_v28 = vpop.f32.mrb[25].mxu1  ;;  %v1170_v30 = vrot.slane %v1143_v27, 4 }
 0x47f   :  { %v1146_v29 = vpop.f32.mrb[26].mxu1 }
 0x480   :  { %v1171_v31 = vrot.slane %v1146_v29, 4  ;;  %v1148_v32 = vpop.f32.mrb[27].mxu1  ;;  %v1187_v29 = vld [vmem:[%s1885_s5] sm:$0x1]  ;;  %s1592_s5 = smov [#allocation9]  }
 0x481   :  { %v1188_v32 = vld [vmem:[%s1886_s6] sm:$0x1]  ;;  %s1289_s6 = sshll.u32 %s1592_s5, 4  ;;  %s1290_s6 = int_to_ptr.vmem [resolvable:$true] %s1289_s6 }
 0x482   :  { %v1172_v33 = vsel %vm69_vm0, %v1170_v30, %v1171_v31  ;;  %s1553_s23 = scalar_lea.vmem %s1290_s6, 512  ;;  %p1558_p11 = scmp.lt.s32.totalorder %s1290_s6, %s1290_s6 }
 0x483   :  { %v1829_v34 = vadd.f32 %v1172_v33, %v1032_v4  ;;  %p1554_p10 = scmp.ne.s32.totalorder %s1290_s6, %s1553_s23  ;;  %p1559_p12 = scmp.lt.s32.totalorder %s1553_s23, %s1553_s23 }
 0x485   :  { %v1151_v35 = vpop.f32.mrb[28].mxu1  ;;  %v1198_v46 = vmul.f32 %v1829_v34, %v1829_v34  ;;  %p1560_p13 = por %p1559_p12, %p1558_p11 }
 0x486   :  { %v1173_v36 = vrot.slane %v1151_v35, 4  ;;  %v1153_v37 = vpop.f32.mrb[29].mxu1 }
 0x487   :  { %v1154_v38 = vpop.f32.mrb[30].mxu1  ;;  %v1253_v37 = vld [vmem:[#allocation3 + $0x8] sm:$0xff]  ;;  %p1561_p0 = pnand %p1560_p13, %p1554_p10 }
 0x488   :  { %v1174_v40 = vsel %vm69_vm0, %v1171_v31, %v1173_v36  ;;  %v1175_v41 = vrot.slane %v1154_v38, 4  ;;  %v1156_v17 = vpop.f32.mrb[31].mxu1  ;;  %v1254_v38 = vld [vmem:[#allocation3 + $0x10] sm:$0xff] }
 0x489   :  { %v1832_v42 = vadd.f32 %v1174_v40, %v1033_v16 }
 0x48a   :  { %v1176_v43 = vsel %vm69_vm0, %v1173_v36, %v1175_v41  ;;  %v1252_v36 = vld [vmem:[#allocation3] sm:$0xff] }
 0x48b   :  { %v1199_v44 = vmul.f32 %v1832_v42, %v1832_v42  ;;  %v1837_v45 = vadd.f32 %v1176_v43, %v1034_v19  ;;  %v1189_v48 = vadd.f32 %v1832_v42, %v1829_v34 }
 0x48d   :  { %v1159_v49 = vpop.f32.mrb[32].mxu1  ;;  %v1202_v53 = vadd.f32 %v1199_v44, %v1198_v46  ;;  %v1200_v54 = vmul.f32 %v1837_v45, %v1837_v45  ;;  %v1190_v59 = vadd.f32 %v1189_v48, %v1837_v45 }
 0x48e   :  { %v1177_v51 = vrot.slane %v1159_v49, 4  ;;  %v1161_v52 = vpop.f32.mrb[33].mxu1 }
 0x48f   :  { %v1162_v55 = vpop.f32.mrb[34].mxu1  ;;  %v1203_v61 = vadd.f32 %v1202_v53, %v1200_v54 }
 0x490   :  { %v1178_v56 = vsel %vm69_vm0, %v1175_v41, %v1177_v51  ;;  %v1163_v58 = vpop.f32.mrb[35].mxu1  ;;  %v1255_v41 = vld [vmem:[#allocation3 + $0x18] sm:$0xff] }
 0x491   :  { %v1186_v60 = vadd.f32 %v1178_v56, %v1035_v26 }
 0x493   :  { %v1191_v1 = vadd.f32 %v1190_v59, %v1186_v60  ;;  %v1201_v2 = vmul.f32 %v1186_v60, %v1186_v60 }
 0x495   :  { %v1192_v3 = vrot.slane %v1191_v1, 4  ;;  %v1204_v0 = vadd.f32 %v1203_v61, %v1201_v2 }
 0x497   :  { %v1193_v4 = vadd.f32 %v1192_v3, %v1191_v1  ;;  %v1205_v5 = vrot.slane %v1204_v0, 4 }
 0x499   :  { %v1194_v6 = vrot.slane %v1193_v4, 2  ;;  %v1206_v7 = vadd.f32 %v1205_v5, %v1204_v0 }
 0x49b   :  { %v1195_v8 = vadd.f32 %v1194_v6, %v1193_v4  ;;  %v1207_v9 = vrot.slane %v1206_v7, 2 }
 0x49d   :  { %v1196_v10 = vrot.slane %v1195_v8, 1  ;;  %v1208_v11 = vadd.f32 %v1207_v9, %v1206_v7 }
 0x49f   :  { %v1209_v12 = vrot.slane %v1208_v11, 1  ;;  %v1197_v13 = vadd.f32 %v1196_v10, %v1195_v8 }
 0x4a1   :  { %v1210_v14 = vadd.f32 %v1209_v12, %v1208_v11 }
 0x4a3   :  { %v1211_v15 = vsel %vm96_vm6, %v1197_v13, %v1210_v14 }
 0x4a4   :  { %1212 = vrot.lane.b32.xlu0 %v1211_v15, %s1586_s25 }
 0x516   :  { %v1213_v16 = vpop.permute.xlu0 %1212 }
 0x517   :  { %v1214_v18 = vadd.f32 %v1213_v16, %v1211_v15 }
 0x519   :  { %1215 = vrot.lane.b32.xlu1 %v1214_v18, %s1589_s2 }
 0x58b   :  { %v1216_v19 = vpop.permute.xlu1 %1215 }
 0x58c   :  { %v1217_v39 = vadd.f32 %v1216_v19, %v1214_v18 }
 0x58e   :  { %1218 = vrot.lane.b32.xlu0 %v1217_v39, %s1590_s12 }
 0x600   :  { %v1219_v20 = vpop.permute.xlu0 %1218 }
 0x601   :  { %v1220_v47 = vadd.f32 %v1219_v20, %v1217_v39 }
 0x603   :  { %1221 = vrot.lane.b32.xlu1 %v1220_v47, %s1582_s11 }
 0x675   :  { %v1222_v21 = vpop.permute.xlu1 %1221 }
 0x676   :  { %v1223_v50 = vadd.f32 %v1222_v21, %v1220_v47 }
 0x678   :  { %v1224_v22 = vmul.f32 0.001953125, %v1223_v50 }
 0x67a   :  { %v1225_v62 = vmul.f32 %v1224_v22, %v1224_v22 }
 0x67c   :  { %v1227_v23 = vrot.slane %v1225_v62, 7 }
 0x67e   :  { %v1229_v24 = vsub.f32 %v1224_v22, %v1227_v23 }
 0x680   :  { %v1230_v25 = vadd.f32 1e-05, %v1229_v24 }
 0x682   :  { %1485 = vrsqrt.f32 %v1230_v25 }
 0x68c   :  { %v1486_v26 = vpop.eup %1485 }
 0x68d   :  { %v1239_v27 = vrot.slane %v1486_v26, %v1783_v57 }
 0x68f   :  { %v1240_v28 = vcombine.high %v1239_v27, %v1239_v27 }
 0x691   :  { %v1247_v30 = vrot.slane %v1240_v28, %v1783_v57 }
 0x693   :  { %v1249_v31 = vmul.f32 %v1247_v30, %v1187_v29 }
 0x695   :  { %v1250_v33 = vmul.f32 %v1249_v31, %v1224_v22  ;;  %v1260_v35 = vrot.slane %v1249_v31, %v1789_v63 }
 0x697   :  { %v1251_v40 = vsub.f32 %v1188_v32, %v1250_v33  ;;  %v1262_v17 = vmul.f32 %v1260_v35, %v1829_v34  ;;  %v1263_v43 = vmul.f32 %v1260_v35, %v1832_v42  ;;  %v1264_v44 = vmul.f32 %v1260_v35, %v1837_v45 }
 0x698   :  { %v1265_v57 = vmul.f32 %v1260_v35, %v1186_v60 }
 0x699   :  { %v1274_v46 = vrot.slane %v1251_v40, %v1789_v63  ;;  %v1266_v48 = vadd.f32 %v1262_v17, %v1252_v36  ;;  %v1267_v49 = vadd.f32 %v1263_v43, %v1253_v37  ;;  %v1268_v51 = vadd.f32 %v1264_v44, %v1254_v38 }
 0x69a   :  { %v1269_v52 = vadd.f32 %v1265_v57, %v1255_v41 }
 0x69b   :  { %v1276_v53 = vadd.f32 %v1274_v46, %v1266_v48  ;;  %v1277_v54 = vadd.f32 %v1274_v46, %v1267_v49  ;;  %v1278_v55 = vadd.f32 %v1274_v46, %v1268_v51 }
 0x69c   :  { %v1279_v56 = vadd.f32 %v1274_v46, %v1269_v52 }
 0x69d   :  { %1280 = vst [vmem:[#allocation9] sm:$0xff] %v1276_v53  ;;  %1281 = vst [vmem:[#allocation9 + $0x8] sm:$0xff] %v1277_v54 }
 0x69e   :  { %1282 = vst [vmem:[#allocation9 + $0x10] sm:$0xff] %v1278_v55  ;;  %1283 = vst [vmem:[#allocation9 + $0x18] sm:$0xff] %v1279_v56 }
 0x69f   :  { %1564 = shalt.err (!%p1561_p0)
}
 0x6a0   :  { %s1565_s27 = scalar_lea.hbm %s1887_s7, 512 }
 0x6a1   :  { %p1566_p1 = scmp.ne.s32.totalorder %s1887_s7, %s1565_s27  ;;  %p1569_p2 = scmp.lt.u32.totalorder %s1565_s27, %s1887_s7 }
 0x6a3   :  { %p1571_p3 = pnand %p1569_p2, %p1566_p1 }
 0x6a5   :  { %1574 = shalt.err (!%p1571_p3)
}
 0x6a6   :  { %1295 = dma.vmem_to_hbm [thread:$0]  %s1290_s6, 512, %s1887_s7, [#allocation5], %s1585_s1, %s1585_s1, %s1586_s25  }
 0x6a7   :  { %1579 = dma.done.wait [#allocation5], 512  }
 0x6a8   :  { %1580 = vsyncadd [#allocation5], 4294966784 }
 0x6a9   :  { %1299 = vsyncpa [#allocation4], 1 }
 0x6aa   :  { %1300 = vsyncpa [#allocation7], 1 }
 0x6ab   :  { %1301 = vsyncpa [#allocation5], 1 }

</bundles_post_ra>
